<compile_context>
chip_gen: v5e
topology: v5e:2x2
jax: 0.10.0
libtpu: 0.0.40
codegen_flags: <defaults>
</compile_context>

<pallas_src>
import jax
import jax.numpy as jnp
import numpy as np
from jax.experimental import pallas as pl
from jax.experimental.pallas import tpu as pltpu

NEG_SLOPE = 0.2
# 3x3 taps, ordered kh-major then kw, matching the (O, kh, kw, I) weight reshape
# in the wrapper.
_TAPS = tuple((dh, dw) for dh in (-1, 0, 1) for dw in (-1, 0, 1))


def _leaky_relu(x):
    return jnp.where(x > 0, x, NEG_SLOPE * x)


def _make_resblock_kernel(H, W, C, mxu_dtype):
    HW = H * W

    def kernel(x_ref, w1_ref, b1_ref, w2_ref, b2_ref, o_ref):
        x = x_ref[...]                                   # (C, HW) f32 residual

        # Column-of-pixel index, built once and shared by both convs.
        col = jax.lax.broadcasted_iota(jnp.int32, (1, HW), 1)
        if W & (W - 1) == 0:
            col = jnp.bitwise_and(col, W - 1)
        else:
            col = col % W
        left_invalid = col == 0                          # tap dw == -1 falls off-image
        right_invalid = col == W - 1                     # tap dw == +1 falls off-image

        def im2col(src):
            """src: (C, HW) value -> (9C, HW) patch matrix, 'same' padding.

            For tap (dh, dw), row block t*C+ci holds src[ci, i + dh*W + dw] with
            zeros where the tap falls outside the HxW image.  The flat shift with
            end-zero-fill handles the top/bottom rows; the column masks zero the
            contributions that wrapped across a row boundary (left/right edges)."""
            zero = jnp.zeros((), src.dtype)
            blocks = []
            for (dh, dw) in _TAPS:
                s = dh * W + dw                          # flat-index shift of this tap
                if s > 0:
                    v = jnp.concatenate(
                        [src[:, s:], jnp.zeros((C, s), src.dtype)], axis=1)
                elif s < 0:
                    v = jnp.concatenate(
                        [jnp.zeros((C, -s), src.dtype), src[:, :HW + s]], axis=1)
                else:
                    v = src
                if dw == 1:
                    v = jnp.where(right_invalid, zero, v)
                elif dw == -1:
                    v = jnp.where(left_invalid, zero, v)
                blocks.append(v)
            return jnp.concatenate(blocks, axis=0)       # (9C, HW)

        # ---- conv1: single im2col matmul on the MXU, f32 accumulation ----
        p1 = im2col(x.astype(mxu_dtype))
        y = jnp.dot(w1_ref[...], p1, preferred_element_type=jnp.float32)
        y = _leaky_relu(y + b1_ref[...])                 # bias + activation in f32

        # ---- conv2 + residual + leaky_relu ----
        p2 = im2col(y.astype(mxu_dtype))
        z = jnp.dot(w2_ref[...], p2, preferred_element_type=jnp.float32)
        z = z + b2_ref[...] + x
        o_ref[...] = _leaky_relu(z).astype(o_ref.dtype)  # lane-dense (C, HW) store

    return kernel


def resblock_pallas(x_nchw, w1_oihw, b1, w2_oihw, b2, *, mxu_dtype=jnp.float32):
    """PyTorch-semantics ResBlock forward. x: (N, C, H, W) float32."""
    N, C, H, W = x_nchw.shape
    HW = H * W

    # Channel-major, spatially flattened activations (free reshape, no transpose/pad).
    x_flat = x_nchw.reshape(N, C, HW).astype(jnp.float32)

    def w_mat(w):   # OIHW -> (Cout, 9*Cin), columns ordered (kh, kw, ci) to match _TAPS
        return jnp.transpose(w, (0, 2, 3, 1)).reshape(C, 9 * C).astype(mxu_dtype)

    w1m, w2m = w_mat(w1_oihw), w_mat(w2_oihw)
    b1r = b1.reshape(C, 1).astype(jnp.float32)
    b2r = b2.reshape(C, 1).astype(jnp.float32)

    kernel = _make_resblock_kernel(H, W, C, mxu_dtype)

    # TODO(synk): for large H*W / C, add a spatial row-tile grid axis (1-row halo)
    # and/or fold several batch elements into the lane dim per step to enlarge the
    # matmul N, keeping double-buffered blocks inside v7x's 64 MiB VMEM.
    out_flat = pl.pallas_call(
        kernel,
        out_shape=jax.ShapeDtypeStruct((N, C, HW), jnp.float32),
        grid_spec=pltpu.PrefetchScalarGridSpec(
            num_scalar_prefetch=0,
            grid=(N,),
            in_specs=[
                pl.BlockSpec((None, C, HW), lambda n: (n, 0, 0)),
                # Constant index maps: weights/biases are DMA'd once and stay
                # resident in VMEM across the batch grid (no per-step re-fetch).
                pl.BlockSpec((C, 9 * C), lambda n: (0, 0)),
                pl.BlockSpec((C, 1), lambda n: (0, 0)),
                pl.BlockSpec((C, 9 * C), lambda n: (0, 0)),
                pl.BlockSpec((C, 1), lambda n: (0, 0)),
            ],
            out_specs=pl.BlockSpec((None, C, HW), lambda n: (n, 0, 0)),
        ),
        compiler_params=pltpu.CompilerParams(
            dimension_semantics=("parallel",),           # batch split across TCs (v7x)
            vmem_limit_bytes=32 * 1024 * 1024,
        ),
    )(x_flat, w1m, b1r, w2m, b2r)

    return out_flat.reshape(N, C, H, W)


def resblock_reference(x_nchw, w1_oihw, b1, w2_oihw, b2):
    dn = jax.lax.conv_dimension_numbers(
        x_nchw.shape, w1_oihw.shape, ("NCHW", "OIHW", "NCHW"))
    y = jax.lax.conv_general_dilated(
        x_nchw, w1_oihw, (1, 1), "SAME", dimension_numbers=dn)
    y = y + b1.reshape(1, -1, 1, 1)
    y = jnp.where(y > 0, y, NEG_SLOPE * y)
    z = jax.lax.conv_general_dilated(
        y, w2_oihw, (1, 1), "SAME", dimension_numbers=dn)
    z = z + b2.reshape(1, -1, 1, 1) + x_nchw
    return jnp.where(z > 0, z, NEG_SLOPE * z)


if __name__ == "__main__":
    N, C, H, W = 2, 4, 16, 16

    key = jax.random.PRNGKey(0)
    kx, kw1, kb1, kw2, kb2 = jax.random.split(key, 5)

    x = jax.random.normal(kx, (N, C, H, W), dtype=jnp.float32)
    # Conv2d(in_ch, in_ch, 3) parameter shapes: OIHW weights + per-channel bias.
    w1 = 0.1 * jax.random.normal(kw1, (C, C, 3, 3), dtype=jnp.float32)
    b1 = 0.1 * jax.random.normal(kb1, (C,), dtype=jnp.float32)
    w2 = 0.1 * jax.random.normal(kw2, (C, C, 3, 3), dtype=jnp.float32)
    b2 = 0.1 * jax.random.normal(kb2, (C,), dtype=jnp.float32)

    ref = jax.block_until_ready(resblock_reference(x, w1, b1, w2, b2))

    # Exact f32 path.
    out_f32 = jax.block_until_ready(
        resblock_pallas(x, w1, b1, w2, b2, mxu_dtype=jnp.float32))
    assert out_f32.shape == (N, C, H, W)
    np.testing.assert_allclose(np.asarray(out_f32), np.asarray(ref),
                               rtol=1e-5, atol=1e-5)

    # bf16 MXU inputs / f32 accumulation (v5e/v6e/v7x MXU rate, halved weight/patch
    # vreg traffic); elementwise epilogue stays f32.
    out_bf16 = jax.block_until_ready(
        resblock_pallas(x, w1, b1, w2, b2, mxu_dtype=jnp.bfloat16))
    np.testing.assert_allclose(np.asarray(out_bf16), np.asarray(ref),
                               rtol=5e-2, atol=5e-2)

    print("KERNEL_OK")
</pallas_src>

<mosaic_0001>
module attributes {stable_mosaic.version = 11 : i64} {
  func.func @kernel(%arg0: i32, %arg1: memref<1x4x256xf32, #tpu.memory_space<vmem>>, %arg2: memref<4x36xf32, #tpu.memory_space<vmem>>, %arg3: memref<4x1xf32, #tpu.memory_space<vmem>>, %arg4: memref<4x36xf32, #tpu.memory_space<vmem>>, %arg5: memref<4x1xf32, #tpu.memory_space<vmem>>, %arg6: memref<1x4x256xf32, #tpu.memory_space<vmem>>) attributes {dimension_semantics = [#tpu.dimension_semantics<parallel>], iteration_bounds = array<i64: 2>, scalar_prefetch = 0 : i64, scratch_operands = 0 : i64, tpu.core_type = #tpu.core_type<tc>, window_params = [{transform_indices = @transform_0, window_bounds = array<i64: 1, 4, 256>}, {pipeline_mode = #tpu.pipeline_mode<synchronous>, transform_indices = @transform_1, window_bounds = array<i64: 4, 36>}, {pipeline_mode = #tpu.pipeline_mode<synchronous>, transform_indices = @transform_2, window_bounds = array<i64: 4, 1>}, {pipeline_mode = #tpu.pipeline_mode<synchronous>, transform_indices = @transform_3, window_bounds = array<i64: 4, 36>}, {pipeline_mode = #tpu.pipeline_mode<synchronous>, transform_indices = @transform_4, window_bounds = array<i64: 4, 1>}, {transform_indices = @transform_5, window_bounds = array<i64: 1, 4, 256>}]} {
    %c0 = arith.constant 0 : index
    %c0_0 = arith.constant 0 : index
    %c0_1 = arith.constant 0 : index
    %0 = vector.load %arg1[%c0, %c0_0, %c0_1] : memref<1x4x256xf32, #tpu.memory_space<vmem>>, vector<1x4x256xf32>
    %1 = vector.shape_cast %0 : vector<1x4x256xf32> to vector<4x256xf32>
    %2 = tpu.iota {dimensions = array<i32: 1>} : vector<1x256xi32>
    %c15_i32 = arith.constant 15 : i32
    %3 = vector.broadcast %c15_i32 : i32 to vector<1x256xi32>
    %4 = arith.andi %2, %3 : vector<1x256xi32>
    %c0_i32 = arith.constant 0 : i32
    %5 = vector.broadcast %c0_i32 : i32 to vector<1x256xi32>
    %6 = arith.cmpi eq, %4, %5 : vector<1x256xi32>
    %c15_i32_2 = arith.constant 15 : i32
    %7 = vector.broadcast %c15_i32_2 : i32 to vector<1x256xi32>
    %8 = arith.cmpi eq, %4, %7 : vector<1x256xi32>
    %cst = arith.constant 0.000000e+00 : f32
    %9 = vector.broadcast %cst : f32 to vector<4x17xf32>
    %10 = vector.extract_strided_slice %1 {offsets = [0, 0], sizes = [4, 239], strides = [1, 1]} : vector<4x256xf32> to vector<4x239xf32>
    %11 = tpu.concatenate %9, %10 in 1 : vector<4x17xf32>, vector<4x239xf32> -> vector<4x256xf32>
    %cst_3 = arith.constant 0.000000e+00 : f32
    %12 = vector.shape_cast %6 : vector<1x256xi1> to vector<1x256xi1>
    %13 = vector.broadcast %12 : vector<1x256xi1> to vector<4x256xi1>
    %14 = vector.broadcast %cst_3 : f32 to vector<4x256xf32>
    %15 = arith.select %13, %14, %11 : vector<4x256xi1>, vector<4x256xf32>
    %cst_4 = arith.constant 0.000000e+00 : f32
    %16 = vector.broadcast %cst_4 : f32 to vector<4x16xf32>
    %17 = vector.extract_strided_slice %1 {offsets = [0, 0], sizes = [4, 240], strides = [1, 1]} : vector<4x256xf32> to vector<4x240xf32>
    %18 = tpu.concatenate %16, %17 in 1 : vector<4x16xf32>, vector<4x240xf32> -> vector<4x256xf32>
    %cst_5 = arith.constant 0.000000e+00 : f32
    %19 = vector.broadcast %cst_5 : f32 to vector<4x15xf32>
    %20 = vector.extract_strided_slice %1 {offsets = [0, 0], sizes = [4, 241], strides = [1, 1]} : vector<4x256xf32> to vector<4x241xf32>
    %21 = tpu.concatenate %19, %20 in 1 : vector<4x15xf32>, vector<4x241xf32> -> vector<4x256xf32>
    %cst_6 = arith.constant 0.000000e+00 : f32
    %22 = vector.shape_cast %8 : vector<1x256xi1> to vector<1x256xi1>
    %23 = vector.broadcast %22 : vector<1x256xi1> to vector<4x256xi1>
    %24 = vector.broadcast %cst_6 : f32 to vector<4x256xf32>
    %25 = arith.select %23, %24, %21 : vector<4x256xi1>, vector<4x256xf32>
    %cst_7 = arith.constant 0.000000e+00 : f32
    %26 = vector.broadcast %cst_7 : f32 to vector<4x1xf32>
    %27 = vector.extract_strided_slice %1 {offsets = [0, 0], sizes = [4, 255], strides = [1, 1]} : vector<4x256xf32> to vector<4x255xf32>
    %28 = tpu.concatenate %26, %27 in 1 : vector<4x1xf32>, vector<4x255xf32> -> vector<4x256xf32>
    %cst_8 = arith.constant 0.000000e+00 : f32
    %29 = vector.shape_cast %6 : vector<1x256xi1> to vector<1x256xi1>
    %30 = vector.broadcast %29 : vector<1x256xi1> to vector<4x256xi1>
    %31 = vector.broadcast %cst_8 : f32 to vector<4x256xf32>
    %32 = arith.select %30, %31, %28 : vector<4x256xi1>, vector<4x256xf32>
    %33 = vector.extract_strided_slice %1 {offsets = [0, 1], sizes = [4, 255], strides = [1, 1]} : vector<4x256xf32> to vector<4x255xf32>
    %cst_9 = arith.constant 0.000000e+00 : f32
    %34 = vector.broadcast %cst_9 : f32 to vector<4x1xf32>
    %35 = tpu.concatenate %33, %34 in 1 : vector<4x255xf32>, vector<4x1xf32> -> vector<4x256xf32>
    %cst_10 = arith.constant 0.000000e+00 : f32
    %36 = vector.shape_cast %8 : vector<1x256xi1> to vector<1x256xi1>
    %37 = vector.broadcast %36 : vector<1x256xi1> to vector<4x256xi1>
    %38 = vector.broadcast %cst_10 : f32 to vector<4x256xf32>
    %39 = arith.select %37, %38, %35 : vector<4x256xi1>, vector<4x256xf32>
    %40 = vector.extract_strided_slice %1 {offsets = [0, 15], sizes = [4, 241], strides = [1, 1]} : vector<4x256xf32> to vector<4x241xf32>
    %cst_11 = arith.constant 0.000000e+00 : f32
    %41 = vector.broadcast %cst_11 : f32 to vector<4x15xf32>
    %42 = tpu.concatenate %40, %41 in 1 : vector<4x241xf32>, vector<4x15xf32> -> vector<4x256xf32>
    %cst_12 = arith.constant 0.000000e+00 : f32
    %43 = vector.shape_cast %6 : vector<1x256xi1> to vector<1x256xi1>
    %44 = vector.broadcast %43 : vector<1x256xi1> to vector<4x256xi1>
    %45 = vector.broadcast %cst_12 : f32 to vector<4x256xf32>
    %46 = arith.select %44, %45, %42 : vector<4x256xi1>, vector<4x256xf32>
    %47 = vector.extract_strided_slice %1 {offsets = [0, 16], sizes = [4, 240], strides = [1, 1]} : vector<4x256xf32> to vector<4x240xf32>
    %cst_13 = arith.constant 0.000000e+00 : f32
    %48 = vector.broadcast %cst_13 : f32 to vector<4x16xf32>
    %49 = tpu.concatenate %47, %48 in 1 : vector<4x240xf32>, vector<4x16xf32> -> vector<4x256xf32>
    %50 = vector.extract_strided_slice %1 {offsets = [0, 17], sizes = [4, 239], strides = [1, 1]} : vector<4x256xf32> to vector<4x239xf32>
    %cst_14 = arith.constant 0.000000e+00 : f32
    %51 = vector.broadcast %cst_14 : f32 to vector<4x17xf32>
    %52 = tpu.concatenate %50, %51 in 1 : vector<4x239xf32>, vector<4x17xf32> -> vector<4x256xf32>
    %cst_15 = arith.constant 0.000000e+00 : f32
    %53 = vector.shape_cast %8 : vector<1x256xi1> to vector<1x256xi1>
    %54 = vector.broadcast %53 : vector<1x256xi1> to vector<4x256xi1>
    %55 = vector.broadcast %cst_15 : f32 to vector<4x256xf32>
    %56 = arith.select %54, %55, %52 : vector<4x256xi1>, vector<4x256xf32>
    %57 = tpu.concatenate %15, %18, %25, %32, %1, %39, %46, %49, %56 in 0 : vector<4x256xf32>, vector<4x256xf32>, vector<4x256xf32>, vector<4x256xf32>, vector<4x256xf32>, vector<4x256xf32>, vector<4x256xf32>, vector<4x256xf32>, vector<4x256xf32> -> vector<36x256xf32>
    %c0_16 = arith.constant 0 : index
    %c0_17 = arith.constant 0 : index
    %58 = vector.load %arg2[%c0_16, %c0_17] : memref<4x36xf32, #tpu.memory_space<vmem>>, vector<4x36xf32>
    %cst_18 = arith.constant dense<0.000000e+00> : vector<4x256xf32>
    %59 = tpu.matmul %58, %57, %cst_18 {dimension_numbers = #tpu.dot_dimension_numbers<[1], [0], [0], [1], [0, 0, 1, 1], [], []>} : vector<4x36xf32>, vector<36x256xf32>, vector<4x256xf32> -> vector<4x256xf32>
    %c0_19 = arith.constant 0 : index
    %c0_20 = arith.constant 0 : index
    %60 = vector.load %arg3[%c0_19, %c0_20] : memref<4x1xf32, #tpu.memory_space<vmem>>, vector<4x1xf32>
    %61 = vector.broadcast %60 : vector<4x1xf32> to vector<4x256xf32>
    %62 = arith.addf %59, %61 : vector<4x256xf32>
    %cst_21 = arith.constant 0.000000e+00 : f32
    %63 = vector.broadcast %cst_21 : f32 to vector<4x256xf32>
    %64 = arith.cmpf ogt, %62, %63 : vector<4x256xf32>
    %cst_22 = arith.constant 2.000000e-01 : f32
    %65 = vector.broadcast %cst_22 : f32 to vector<4x256xf32>
    %66 = arith.mulf %65, %62 : vector<4x256xf32>
    %67 = arith.select %64, %62, %66 : vector<4x256xi1>, vector<4x256xf32>
    %cst_23 = arith.constant 0.000000e+00 : f32
    %68 = vector.broadcast %cst_23 : f32 to vector<4x17xf32>
    %69 = vector.extract_strided_slice %67 {offsets = [0, 0], sizes = [4, 239], strides = [1, 1]} : vector<4x256xf32> to vector<4x239xf32>
    %70 = tpu.concatenate %68, %69 in 1 : vector<4x17xf32>, vector<4x239xf32> -> vector<4x256xf32>
    %cst_24 = arith.constant 0.000000e+00 : f32
    %71 = vector.shape_cast %6 : vector<1x256xi1> to vector<1x256xi1>
    %72 = vector.broadcast %71 : vector<1x256xi1> to vector<4x256xi1>
    %73 = vector.broadcast %cst_24 : f32 to vector<4x256xf32>
    %74 = arith.select %72, %73, %70 : vector<4x256xi1>, vector<4x256xf32>
    %cst_25 = arith.constant 0.000000e+00 : f32
    %75 = vector.broadcast %cst_25 : f32 to vector<4x16xf32>
    %76 = vector.extract_strided_slice %67 {offsets = [0, 0], sizes = [4, 240], strides = [1, 1]} : vector<4x256xf32> to vector<4x240xf32>
    %77 = tpu.concatenate %75, %76 in 1 : vector<4x16xf32>, vector<4x240xf32> -> vector<4x256xf32>
    %cst_26 = arith.constant 0.000000e+00 : f32
    %78 = vector.broadcast %cst_26 : f32 to vector<4x15xf32>
    %79 = vector.extract_strided_slice %67 {offsets = [0, 0], sizes = [4, 241], strides = [1, 1]} : vector<4x256xf32> to vector<4x241xf32>
    %80 = tpu.concatenate %78, %79 in 1 : vector<4x15xf32>, vector<4x241xf32> -> vector<4x256xf32>
    %cst_27 = arith.constant 0.000000e+00 : f32
    %81 = vector.shape_cast %8 : vector<1x256xi1> to vector<1x256xi1>
    %82 = vector.broadcast %81 : vector<1x256xi1> to vector<4x256xi1>
    %83 = vector.broadcast %cst_27 : f32 to vector<4x256xf32>
    %84 = arith.select %82, %83, %80 : vector<4x256xi1>, vector<4x256xf32>
    %cst_28 = arith.constant 0.000000e+00 : f32
    %85 = vector.broadcast %cst_28 : f32 to vector<4x1xf32>
    %86 = vector.extract_strided_slice %67 {offsets = [0, 0], sizes = [4, 255], strides = [1, 1]} : vector<4x256xf32> to vector<4x255xf32>
    %87 = tpu.concatenate %85, %86 in 1 : vector<4x1xf32>, vector<4x255xf32> -> vector<4x256xf32>
    %cst_29 = arith.constant 0.000000e+00 : f32
    %88 = vector.shape_cast %6 : vector<1x256xi1> to vector<1x256xi1>
    %89 = vector.broadcast %88 : vector<1x256xi1> to vector<4x256xi1>
    %90 = vector.broadcast %cst_29 : f32 to vector<4x256xf32>
    %91 = arith.select %89, %90, %87 : vector<4x256xi1>, vector<4x256xf32>
    %92 = vector.extract_strided_slice %67 {offsets = [0, 1], sizes = [4, 255], strides = [1, 1]} : vector<4x256xf32> to vector<4x255xf32>
    %cst_30 = arith.constant 0.000000e+00 : f32
    %93 = vector.broadcast %cst_30 : f32 to vector<4x1xf32>
    %94 = tpu.concatenate %92, %93 in 1 : vector<4x255xf32>, vector<4x1xf32> -> vector<4x256xf32>
    %cst_31 = arith.constant 0.000000e+00 : f32
    %95 = vector.shape_cast %8 : vector<1x256xi1> to vector<1x256xi1>
    %96 = vector.broadcast %95 : vector<1x256xi1> to vector<4x256xi1>
    %97 = vector.broadcast %cst_31 : f32 to vector<4x256xf32>
    %98 = arith.select %96, %97, %94 : vector<4x256xi1>, vector<4x256xf32>
    %99 = vector.extract_strided_slice %67 {offsets = [0, 15], sizes = [4, 241], strides = [1, 1]} : vector<4x256xf32> to vector<4x241xf32>
    %cst_32 = arith.constant 0.000000e+00 : f32
    %100 = vector.broadcast %cst_32 : f32 to vector<4x15xf32>
    %101 = tpu.concatenate %99, %100 in 1 : vector<4x241xf32>, vector<4x15xf32> -> vector<4x256xf32>
    %cst_33 = arith.constant 0.000000e+00 : f32
    %102 = vector.shape_cast %6 : vector<1x256xi1> to vector<1x256xi1>
    %103 = vector.broadcast %102 : vector<1x256xi1> to vector<4x256xi1>
    %104 = vector.broadcast %cst_33 : f32 to vector<4x256xf32>
    %105 = arith.select %103, %104, %101 : vector<4x256xi1>, vector<4x256xf32>
    %106 = vector.extract_strided_slice %67 {offsets = [0, 16], sizes = [4, 240], strides = [1, 1]} : vector<4x256xf32> to vector<4x240xf32>
    %cst_34 = arith.constant 0.000000e+00 : f32
    %107 = vector.broadcast %cst_34 : f32 to vector<4x16xf32>
    %108 = tpu.concatenate %106, %107 in 1 : vector<4x240xf32>, vector<4x16xf32> -> vector<4x256xf32>
    %109 = vector.extract_strided_slice %67 {offsets = [0, 17], sizes = [4, 239], strides = [1, 1]} : vector<4x256xf32> to vector<4x239xf32>
    %cst_35 = arith.constant 0.000000e+00 : f32
    %110 = vector.broadcast %cst_35 : f32 to vector<4x17xf32>
    %111 = tpu.concatenate %109, %110 in 1 : vector<4x239xf32>, vector<4x17xf32> -> vector<4x256xf32>
    %cst_36 = arith.constant 0.000000e+00 : f32
    %112 = vector.shape_cast %8 : vector<1x256xi1> to vector<1x256xi1>
    %113 = vector.broadcast %112 : vector<1x256xi1> to vector<4x256xi1>
    %114 = vector.broadcast %cst_36 : f32 to vector<4x256xf32>
    %115 = arith.select %113, %114, %111 : vector<4x256xi1>, vector<4x256xf32>
    %116 = tpu.concatenate %74, %77, %84, %91, %67, %98, %105, %108, %115 in 0 : vector<4x256xf32>, vector<4x256xf32>, vector<4x256xf32>, vector<4x256xf32>, vector<4x256xf32>, vector<4x256xf32>, vector<4x256xf32>, vector<4x256xf32>, vector<4x256xf32> -> vector<36x256xf32>
    %c0_37 = arith.constant 0 : index
    %c0_38 = arith.constant 0 : index
    %117 = vector.load %arg4[%c0_37, %c0_38] : memref<4x36xf32, #tpu.memory_space<vmem>>, vector<4x36xf32>
    %cst_39 = arith.constant dense<0.000000e+00> : vector<4x256xf32>
    %118 = tpu.matmul %117, %116, %cst_39 {dimension_numbers = #tpu.dot_dimension_numbers<[1], [0], [0], [1], [0, 0, 1, 1], [], []>} : vector<4x36xf32>, vector<36x256xf32>, vector<4x256xf32> -> vector<4x256xf32>
    %c0_40 = arith.constant 0 : index
    %c0_41 = arith.constant 0 : index
    %119 = vector.load %arg5[%c0_40, %c0_41] : memref<4x1xf32, #tpu.memory_space<vmem>>, vector<4x1xf32>
    %120 = vector.broadcast %119 : vector<4x1xf32> to vector<4x256xf32>
    %121 = arith.addf %118, %120 : vector<4x256xf32>
    %122 = arith.addf %121, %1 : vector<4x256xf32>
    %cst_42 = arith.constant 0.000000e+00 : f32
    %123 = vector.broadcast %cst_42 : f32 to vector<4x256xf32>
    %124 = arith.cmpf ogt, %122, %123 : vector<4x256xf32>
    %cst_43 = arith.constant 2.000000e-01 : f32
    %125 = vector.broadcast %cst_43 : f32 to vector<4x256xf32>
    %126 = arith.mulf %125, %122 : vector<4x256xf32>
    %127 = arith.select %124, %122, %126 : vector<4x256xi1>, vector<4x256xf32>
    %c0_44 = arith.constant 0 : index
    %c0_45 = arith.constant 0 : index
    %c0_46 = arith.constant 0 : index
    %128 = vector.load %arg6[%c0_44, %c0_45, %c0_46] : memref<1x4x256xf32, #tpu.memory_space<vmem>>, vector<1x4x256xf32>
    %129 = vector.shape_cast %128 : vector<1x4x256xf32> to vector<4x256xf32>
    %130 = vector.shape_cast %127 : vector<4x256xf32> to vector<1x4x256xf32>
    tpu.vector_store %arg6[%c0_44, %c0_45, %c0_46], %130 {strides = array<i32>} : memref<1x4x256xf32, #tpu.memory_space<vmem>>, vector<1x4x256xf32>,
    return
  }
  func.func @transform_0(%arg0: i32) -> (i32, i32, i32) {
    %c0_i32 = arith.constant 0 : i32
    %c0_i32_0 = arith.constant 0 : i32
    %c0_i32_1 = arith.constant 0 : i32
    return %arg0, %c0_i32, %c0_i32_0 : i32, i32, i32
  }
  func.func @transform_1(%arg0: i32) -> (i32, i32) {
    %c0_i32 = arith.constant 0 : i32
    %c0_i32_0 = arith.constant 0 : i32
    %c0_i32_1 = arith.constant 0 : i32
    return %c0_i32, %c0_i32_0 : i32, i32
  }
  func.func @transform_2(%arg0: i32) -> (i32, i32) {
    %c0_i32 = arith.constant 0 : i32
    %c0_i32_0 = arith.constant 0 : i32
    %c0_i32_1 = arith.constant 0 : i32
    return %c0_i32, %c0_i32_0 : i32, i32
  }
  func.func @transform_3(%arg0: i32) -> (i32, i32) {
    %c0_i32 = arith.constant 0 : i32
    %c0_i32_0 = arith.constant 0 : i32
    %c0_i32_1 = arith.constant 0 : i32
    return %c0_i32, %c0_i32_0 : i32, i32
  }
  func.func @transform_4(%arg0: i32) -> (i32, i32) {
    %c0_i32 = arith.constant 0 : i32
    %c0_i32_0 = arith.constant 0 : i32
    %c0_i32_1 = arith.constant 0 : i32
    return %c0_i32, %c0_i32_0 : i32, i32
  }
  func.func @transform_5(%arg0: i32) -> (i32, i32, i32) {
    %c0_i32 = arith.constant 0 : i32
    %c0_i32_0 = arith.constant 0 : i32
    %c0_i32_1 = arith.constant 0 : i32
    return %arg0, %c0_i32, %c0_i32_0 : i32, i32, i32
  }
}

</mosaic_0001>

<bundles_post_ra>
// kernel: tpu_custom_call.1
= control target key start
LH: loop header
LB: loop body
LE: loop exit
PB: predicated region body
PF: predicated region fallthrough
CT: control target
= control target key end

     0   :  { %10 = vsyncpa [#allocation3], 0  ;;  %s1315_s0 = inlined_call_operand.hbm [shape: f32[2,4,256], index: 0, kind: input, shape index: {}]   ;;  %s1316_s1 = inlined_call_operand.vmem [shape: f32[4,36], index: 1, kind: input, shape index: {}]   ;;  %s1317_s2 = inlined_call_operand.vmem [shape: f32[4,1], index: 2, kind: input, shape index: {}]   ;;  %s1318_s3 = inlined_call_operand.vmem [shape: f32[4,36], index: 3, kind: input, shape index: {}]   ;;  %s1319_s4 = inlined_call_operand.vmem [shape: f32[4,1], index: 4, kind: input, shape index: {}]   ;;  %s1320_s5 = inlined_call_operand.hbm [shape: f32[2,4,256], index: 5, kind: output, shape index: {}]  }
   0x1   :  { %12 = vsyncpa [#allocation3 + $0x1], 0 }
   0x2   :  { %13 = vsyncpa [#allocation4], 0 }
   0x3   :  { %15 = vsyncpa [#allocation4 + $0x1], 0  ;;  %s1023_s18 = smov 0   ;;  %s1025_s19 = smov 0  }
   0x4   :  { %s1027_s20 = smov 0   ;;  %s1029_s21 = smov 0  }
   0x5 LB: > { %s1044_s22 = sadd.s32 4294967295, %s982_s21   ;;  %s735_s23 = sadd.s32 4294967294, %s982_s21   ;;  %s982_s21 = sphi %s1029_s21, %s1338_s21   ;;  %s978_s20 = sphi %s1027_s20, %s1337_s20   ;;  %s974_s19 = sphi %s1025_s19, %s1336_s19   ;;  %s970_s18 = sphi %s1023_s18, %s1335_s18  }
   0x6   : > { %s1048_s24 = sadd.s32 1, %s982_s21   ;;  %s28_s25 = sadd.s32 1, %s978_s20 }
   0x7   : > { %s25_s26 = ssub.s32 %s982_s21, %s1048_s24  ;;  %p35_p0 = scmp.ne.s32.totalorder %s978_s20, %s974_s19 }
   0x8   : > { %p26_p1 = scmp.eq.s32.totalorder %s25_s26, 0  ;;  %p36_p2 = scmp.eq.s32.totalorder %s982_s21, 0 }
   0x9   : > { %p41_p3 = scmp.ne.s32.totalorder %s974_s19, %s970_s18  ;;  %p42_p4 = scmp.eq.s32.totalorder %s1044_s22, 0 }
   0xa   : > { %s1060_s27 = scalar_select %p26_p1, %s978_s20, %s28_s25  }
   0xb   : > { %p1062_p5 = por %p36_p2, %p35_p0  ;;  %p1066_p6 = por %p42_p4, %p41_p3 }
   0xc   : > { %p149_p7 = scmp.eq.s32.totalorder %s1044_s22, 1  ;;  %p155_p8 = scmp.eq.s32.totalorder %s735_s23, 1 }
   0xd   : > { %p771_p10 = scmp.lt.s32.totalorder %s982_s21, 2  ;;  %s187_s7 = sand.u32 1, %s978_s20  }
   0xe   : > { %p1073_p11 = por %p149_p7, %p35_p0  ;;  %p1077_p12 = por %p155_p8, %p41_p3 }
   0xf   : > { %s757_s8 = sshll.u32 %s982_s21, 3  ;;  %s738_s9 = sshll.u32 %s187_s7, 3 }
  0x10   : > { %s196_s12 = scalar_lea.hbm %s1315_s0, %s757_s8  ;;  %s191_s14 = scalar_lea.vmem [#allocation2], %s738_s9 }
  0x11   : > { %s198_s13 = sshll.u32 %s196_s12, 4  ;;  %s200_s15 = sshll.u32 %s191_s14, 4  ;;  %s199_s13 = int_to_ptr.hbm [resolvable:$true] %s198_s13  ;;  %s201_s15 = int_to_ptr.vmem [resolvable:$true] %s200_s15 }
  0x12   : > { %p1088_p13 = pnand %p771_p10, %p1062_p5  ;;  %p741_p0 = scmp.ge.s32.totalorder %s982_s21, 1 }
  0x13   : > { %p205_p1 = scmp.lt.s32.totalorder %s982_s21, 3  ;;  %s188_s17 = scalar_lea.sflag [#allocation3], %s187_s7 }
  0x14   : > { %s886_s23 = sshra.s32 %s199_s13, 4  ;;  %p890_p3 = pneg %p1088_p13  ;;  %s887_s23 = int_to_ptr.hbm [resolvable:$true] %s886_s23 }
  0x15   : > { %s888_s25 = scalar_lea.hbm %s887_s23, 8  ;;  %s893_s28 = scalar_lea.hbm %s1315_s0, 16 }
  0x16   : > { %p889_p2 = scmp.ne.s32.totalorder %s887_s23, %s888_s25  ;;  %p894_p5 = scmp.lt.s32.totalorder %s887_s23, %s1315_s0 }
  0x17   : > { %p895_p8 = scmp.lt.s32.totalorder %s893_s28, %s888_s25 }
  0x18   : > { %p891_p4 = pnand %p890_p3, %p889_p2 }
  0x19   : > { %p896_p10 = por %p895_p8, %p894_p5 }
  0x1a   : > { %p892_p7 = pneg %p891_p4 }
  0x1c   : > { %p897_p9 = pnand %p896_p10, %p892_p7 }
  0x1e   : > { %900 = shalt.err (!%p897_p9)
}
  0x1f   : > { %766 = dma.hbm_to_vmem [thread:$0]  (!%p1088_p13), %s199_s13, 128, %s201_s15, %s188_s17  }
  0x20   : > { %p206_p2 = pnand %p741_p0, %p205_p1 }
  0x21   : > { %s1109_s7 = sand.u32 (!%p206_p2), 1, %s974_s19  }
  0x22   : > { %209 = sbr.rel (%p206_p2) target bundleno = 661 (0x295), region = 40  ;;  %s742_s11 = sshll.u32 (!%p206_p2), %s1109_s7, 3 }
  0x23   : > { %s212_s12 = scalar_lea.sflag (!%p206_p2), [#allocation3], %s1109_s7  ;;  %s215_s14 = scalar_lea.vmem (!%p206_p2), [#allocation2], %s742_s11 }
  0x27   : > { %961 = dma.done.wait (%p1066_p6), %s212_s12, 128  }
  0x28   : > { %963 = vsyncadd (%p1066_p6), %s212_s12, 4294967168  ;;  %v243_v0 = vld [vmem:[%s215_s14] sm:$0xff]  ;;  %s984_s29 = smov 127   ;;  %s985_s13 = smov 1   ;;  %v244_v26 = vlaneseq  ;;  %v405_v31 = vld [vmem:[%s1317_s2] sm:$0xf] }
  0x29   : > { %254 = vst [vmem:[#allocation1] ss:$2 sm:$0xff] %v243_v0  ;;  %s986_s15 = smov 113   ;;  %s987_s16 = smov 112   ;;  %v992_v32 = vmov 0   ;;  %vm322_vm0 = vcmask 1039360  }
  0x2a   : > { %s988_s17 = smov 16   ;;  %s989_s23 = smov 111   ;;  %v245_v27 = vand.u32 127, %v244_v26  ;;  %849 = vset.pattern.permute.xlu0 %v992_v32  ;;  %885 = vset.pattern.permute.xlu2 %v992_v32  ;;  %vm350_vm2 = vcmask 916480   ;;  %vm336_vm4 = vcmask 924672   ;;  %vm361_vm6 = vcmask 908288  }
  0x2b   : > { %s990_s25 = smov 17   ;;  %s991_s26 = smov 15   ;;  %vm308_vm8 = vcmask 7168   ;;  %vm395_vm9 = vcmask 1043456   ;;  %vm279_vm10 = vcmask 130048   ;;  %vm261_vm11 = vcmask 138240  }
  0x2c   : > { %v246_v30 = vadd.s32 128, %v245_v27  ;;  %v247_v34 = vand.u32 15, %v245_v27  ;;  %vm290_vm12 = vcmask 121856   ;;  %vm411_vm13 = vcmask 293888   ;;  %s649_s8 = scalar_lea.sflag [#allocation4], %s1109_s7  ;;  %s936_s12 = scalar_lea.hbm %s1320_s5, 16 }
  0x2e   : > { %v248_v33 = vand.u32 15, %v246_v30  ;;  %vm1141_vm3 = vcmp.eq.s32.totalorder %v247_v34, 15  ;;  %vm1147_vm5 = vcmp.eq.s32.totalorder %v247_v34, 0 }
  0x30   : > { %v255_v1 = vld.sshfl [vmem:[#allocation1] sm:$0xff pattern:$0x75316420]  ;;  %v256_v2 = vld.sshfl [vmem:[#allocation1 + $0x8] sm:$0xff pattern:$0x75316420] }
  0x31   : > { %272 = vst [vmem:[#allocation1] ss:$2 sm:$0xff] %v243_v0  ;;  %v844_v22 = vpack.i.bf16 %v256_v2, %v255_v1  ;;  %vm1137_vm1 = vcmp.eq.s32.totalorder %v248_v33, 15  ;;  %vm1158_vm7 = vcmp.eq.s32.totalorder %v248_v33, 0 }
  0x38   : > { %v273_v3 = vld.sshfl [vmem:[#allocation1] sm:$0xff pattern:$0x75316420]  ;;  %v274_v4 = vld.sshfl [vmem:[#allocation1 + $0x8] sm:$0xff pattern:$0x75316420] }
  0x39   : > { %283 = vst [vmem:[#allocation1] ss:$2 sm:$0xff] %v243_v0  ;;  %v839_v16 = vpack.i.bf16 %v274_v4, %v273_v3 }
  0x40   : > { %v284_v5 = vld.sshfl [vmem:[#allocation1] sm:$0xff pattern:$0x75316420]  ;;  %v285_v6 = vld.sshfl [vmem:[#allocation1 + $0x8] sm:$0xff pattern:$0x75316420] }
  0x41   : > { %301 = vst [vmem:[#allocation1] ss:$2 sm:$0xff] %v243_v0  ;;  %v834_v23 = vpack.i.bf16 %v285_v6, %v284_v5 }
  0x48   : > { %v302_v7 = vld.sshfl [vmem:[#allocation1] sm:$0xff pattern:$0x75316420]  ;;  %v303_v8 = vld.sshfl [vmem:[#allocation1 + $0x8] sm:$0xff pattern:$0x75316420] }
  0x49   : > { %315 = vst [vmem:[#allocation1] ss:$2 sm:$0xff] %v243_v0  ;;  %v814_v12 = vpack.i.bf16 %v303_v8, %v302_v7 }
  0x4b   : > { %815 = vrot.lane.b32.xlu2 %v814_v12, %s985_s13 }
  0x50   : > { %v316_v9 = vld.sshfl [vmem:[#allocation1] sm:$0xff pattern:$0x75316420]  ;;  %v317_v10 = vld.sshfl [vmem:[#allocation1 + $0x8] sm:$0xff pattern:$0x75316420] }
  0x51   : > { %v819_v11 = vpack.i.bf16 %v316_v9, %v317_v10  ;;  %329 = vst [vmem:[#allocation1] ss:$2 sm:$0xff] %v243_v0 }
  0x53   : > { %820 = vrot.lane.b32.xlu1 %v819_v11, %s984_s29 }
  0x58   : > { %v330_v13 = vld.sshfl [vmem:[#allocation1] sm:$0xff pattern:$0x75316420]  ;;  %v331_v14 = vld.sshfl [vmem:[#allocation1 + $0x8] sm:$0xff pattern:$0x75316420] }
  0x59   : > { %343 = vst [vmem:[#allocation1] ss:$2 sm:$0xff] %v243_v0  ;;  %v824_v15 = vpack.i.bf16 %v330_v13, %v331_v14 }
  0x5b   : > { %825 = vrot.lane.b32.xlu1 %v824_v15, %s986_s15 }
  0x60   : > { %v344_v17 = vld.sshfl [vmem:[#allocation1] sm:$0xff pattern:$0x75316420]  ;;  %v345_v18 = vld.sshfl [vmem:[#allocation1 + $0x8] sm:$0xff pattern:$0x75316420] }
  0x61   : > { %v829_v19 = vpack.i.bf16 %v344_v17, %v345_v18  ;;  %354 = vst [vmem:[#allocation1] ss:$2 sm:$0xff] %v243_v0 }
  0x63   : > { %830 = vrot.lane.b32.xlu0 %v829_v19, %s987_s16  ;;  %840 = vrot.lane.b32.xlu1 %v839_v16, %s988_s17 }
  0x68   : > { %v356_v20 = vld.sshfl [vmem:[#allocation1 + $0x8] sm:$0xff pattern:$0x75316420]  ;;  %v355_v21 = vld.sshfl [vmem:[#allocation1] sm:$0xff pattern:$0x75316420] }
  0x69   : > { %357 = vrot.lane.b32.xlu2 %v355_v21, %s989_s23  ;;  %379 = vst [vmem:[#allocation1] ss:$2 sm:$0xff] %v243_v0 }
  0x6b   : > { %359 = vrot.lane.b32.xlu0 %v356_v20, %s989_s23 }
  0x70   : > { %v1128_v24 = vld.sshfl [vmem:[#allocation1] sm:$0xff pattern:$0x75316420]  ;;  %v1130_v25 = vld.sshfl [vmem:[#allocation1 + $0x8] sm:$0xff pattern:$0x75316420] }
  0x71   : > { %845 = vrot.lane.b32.xlu2 %v844_v22, %s990_s25  ;;  %629 = vst [vmem:[#allocation1] ss:$2 sm:$0xff] %v243_v0 }
  0x73   : > { %835 = vrot.lane.b32.xlu0 %v834_v23, %s991_s26 }
  0x78   : > { %v630_v54 = vld.sshfl [vmem:[#allocation1] sm:$0xff pattern:$0x75316420] }
  0x7b   : > { %408 = vperm.xlu0 %849, %v405_v31  }
  0xa5   : > { %v1132_v29 = vpop.permute.xlu2 %815 }
  0xa6   : > { %v818_v56 = vunpack.i.h.bf16 %v1132_v29  ;;  %v817_v57 = vunpack.i.l.bf16 %v1132_v29 }
  0xa8   : > { %v312_v13 = vsel %vm308_vm8, 0.0, %v817_v57  ;;  %v309_v14 = vsel %vm308_vm8, %v817_v57, %v818_v56 }
  0xa9   : > { %v313_v21 = vsel %vm1147_vm5, 0.0, %v312_v13  ;;  %v314_v23 = vsel %vm1158_vm7, 0.0, %v309_v14 }
  0xaa   : > { %v375_v31 = vrot.slane %v313_v21, 4  ;;  %v376_v33 = vrot.slane %v314_v23, 4 }
  0xc3   : > { %v358_v40 = vpop.permute.xlu2 %357 }
  0xc5   : > { %v821_v28 = vpop.permute.xlu1 %820 }
  0xc6   : > { %v823_v35 = vunpack.i.h.bf16 %v821_v28  ;;  %v822_v36 = vunpack.i.l.bf16 %v821_v28 }
  0xc8   : > { %v326_v44 = vsel %vm322_vm0, %v822_v36, 0.0  ;;  %v323_v47 = vsel %vm322_vm0, %v823_v35, %v822_v36 }
  0xc9   : > { %v328_v49 = vsel %vm1137_vm1, 0.0, %v326_v44  ;;  %v327_v52 = vsel %vm1141_vm3, 0.0, %v323_v47 }
  0xca   : > { %v386_v62 = vrot.slane %v327_v52, 4  ;;  %v387_v63 = vrot.slane %v328_v49, 4 }
  0xcb   : > { %v846_v0 = vpop.permute.xlu2 %845 }
  0xcc   : > { %v848_v9 = vunpack.i.h.bf16 %v846_v0  ;;  %v847_v10 = vunpack.i.l.bf16 %v846_v0  ;;  %v400_v15 = vsel %vm395_vm9, %v1128_v24, %v386_v62  ;;  %v401_v16 = vsel %vm395_vm9, %v1130_v25, %v387_v63  ;;  %v574_v0 = vld [vmem:[%s1319_s4] sm:$0xf] }
  0xcd   : > { %v826_v37 = vpop.permute.xlu1 %825 }
  0xce   : > { %v828_v45 = vunpack.i.h.bf16 %v826_v37  ;;  %v827_v46 = vunpack.i.l.bf16 %v826_v37  ;;  %v265_v19 = vsel %vm261_vm11, 0.0, %v847_v10  ;;  %v262_v20 = vsel %vm261_vm11, %v847_v10, %v848_v9 }
  0xcf   : > { %v270_v28 = vsel %vm1147_vm5, 0.0, %v265_v19  ;;  %v271_v29 = vsel %vm1158_vm7, 0.0, %v262_v20 }
  0xd0   : > { %v337_v53 = vsel %vm336_vm4, %v828_v45, %v827_v46  ;;  %v340_v55 = vsel %vm336_vm4, %v827_v46, 0.0 }
  0xd1   : > { %v341_v3 = vsel %vm1147_vm5, 0.0, %v337_v53  ;;  %v342_v4 = vsel %vm1158_vm7, 0.0, %v340_v55 }
  0xd5   : > { %v831_v39 = vpop.permute.xlu0 %830  ;;  %v841_v58 = vpop.permute.xlu1 %840 }
  0xd6   : > { %v833_v41 = vunpack.i.h.bf16 %v831_v39  ;;  %v832_v42 = vunpack.i.l.bf16 %v831_v39  ;;  %v843_v7 = vunpack.i.h.bf16 %v841_v58  ;;  %v842_v8 = vunpack.i.l.bf16 %v841_v58 }
  0xd8   : > { %v353_v50 = vsel %vm350_vm2, %v832_v42, 0.0  ;;  %v351_v51 = vsel %vm350_vm2, %v833_v41, %v832_v42  ;;  %v282_v17 = vsel %vm279_vm10, 0.0, %v842_v8  ;;  %v280_v18 = vsel %vm279_vm10, %v842_v8, %v843_v7  ;;  %v404_v41 = vld [vmem:[%s1316_s1] sm:$0xf] }
  0xd9   : > { %v392_v59 = vrot.slane %v353_v50, 4  ;;  %v391_v61 = vrot.slane %v351_v51, 4  ;;  %v369_v26 = vrot.slane %v282_v17, 4  ;;  %v370_v27 = vrot.slane %v280_v18, 4 }
  0xdb   : > { %v402_v11 = vsel %vm395_vm9, %v341_v3, %v391_v61  ;;  %v403_v12 = vsel %vm395_vm9, %v342_v4, %v392_v59  ;;  %v396_v39 = vsel %vm395_vm9, %v270_v28, %v369_v26 }
  0xdd   : > { %v360_v60 = vpop.permute.xlu0 %359 }
  0xde   : > { %v362_v1 = vsel %vm361_vm6, %v358_v40, %v360_v60  ;;  %v365_v2 = vsel %vm361_vm6, %v360_v60, 0.0  ;;  %v397_v40 = vsel %vm395_vm9, %v271_v29, %v370_v27 }
  0xdf   : > { %v366_v5 = vsel %vm1141_vm3, 0.0, %v362_v1  ;;  %v367_v6 = vsel %vm1137_vm1, 0.0, %v365_v2 }
  0xe0   : > { %744 = vmatpush.msk.msra.mxu0 %vm395_vm9, %v366_v5  ;;  %746 = vmatpush.msk.msra.mxu1 %vm395_vm9, %v367_v6 }
  0xe2   : > { %433 = vmatpush.msra.mxu0 %v402_v11  ;;  %453 = vmatpush.msra.mxu1 %v403_v12 }
  0xe4   : > { %434 = vmatpush.msra.mxu0 %v400_v15  ;;  %454 = vmatpush.msra.mxu1 %v401_v16 }
  0xe5   : > { %v836_v22 = vpop.permute.xlu0 %835 }
  0xe6   : > { %v838_v24 = vunpack.i.h.bf16 %v836_v22  ;;  %v837_v25 = vunpack.i.l.bf16 %v836_v22 }
  0xe8   : > { %v294_v30 = vsel %vm290_vm12, 0.0, %v837_v25  ;;  %v291_v32 = vsel %vm290_vm12, %v837_v25, %v838_v24 }
  0xe9   : > { %v299_v34 = vsel %vm1141_vm3, 0.0, %v294_v30  ;;  %v300_v35 = vsel %vm1137_vm1, 0.0, %v291_v32 }
  0xea   : > { %v398_v36 = vsel %vm395_vm9, %v299_v34, %v375_v31  ;;  %v399_v37 = vsel %vm395_vm9, %v300_v35, %v376_v33 }
  0xeb   : > { %435 = vmatpush.msra.mxu0 %v398_v36  ;;  %455 = vmatpush.msra.mxu1 %v399_v37 }
  0xed   : > { %436 = vmatpush.msra.mxu0 %v396_v39  ;;  %456 = vmatpush.msra.mxu1 %v397_v40  ;;  %v409_v42 = vpop.permute.xlu0 %408 }
  0xee   : > { %745 = vmatmul.msk.f32.vlgmr.msra.gmra.mxu0 %vm411_vm13, %v404_v41  ;;  %747 = vmatmul.msk.f32.vlgmr.msra.gmra.mxu1 %vm411_vm13, %v404_v41 }
 0x16b   : > { %v438_v44 = vpop.f32.mrf.mxu0  ;;  %v458_v45 = vpop.f32.mrf.mxu1 }
 0x16c   : > { %v439_v46 = vadd.f32 %v438_v44, %v409_v42  ;;  %v459_v47 = vadd.f32 %v458_v45, %v409_v42 }
 0x16e   : > { %vm461_vm14 = vcmp.gt.f32.partialorder %v439_v46, 0.0  ;;  %v463_v49 = vmul.f32 0.2, %v439_v46  ;;  %vm462_vm15 = vcmp.gt.f32.partialorder %v459_v47, 0.0  ;;  %v464_v50 = vmul.f32 0.2, %v459_v47 }
 0x170   : > { %v465_v51 = vsel %vm461_vm14, %v439_v46, %v463_v49  ;;  %v466_v52 = vsel %vm462_vm15, %v459_v47, %v464_v50 }
 0x171   : > { %535 = vrot.lane.b32.xlu2 %v466_v52, %s989_s23  ;;  %533 = vrot.lane.b32.xlu0 %v465_v51, %s989_s23  ;;  %v850_v53 = vpack.i.bf16 %v465_v51, %v466_v52  ;;  %v875_v55 = vpack.i.bf16 %v466_v52, %v465_v51 }
 0x173   : > { %851 = vrot.lane.b32.xlu1 %v850_v53, %s987_s16 }
 0x179   : > { %876 = vrot.lane.b32.xlu0 %v875_v55, %s988_s17  ;;  %861 = vrot.lane.b32.xlu2 %v850_v53, %s986_s15  ;;  %s758_s15 = sshll.u32 %s1044_s22, 3  ;;  %s242_s22 = scalar_lea.vmem [#allocation5], %s742_s11 }
 0x17a   : > { %s660_s23 = scalar_lea.hbm %s1320_s5, %s758_s15 }
 0x17b   : > { %856 = vrot.lane.b32.xlu1 %v850_v53, %s984_s29 }
 0x181   : > { %871 = vrot.lane.b32.xlu2 %v875_v55, %s991_s26  ;;  %s664_s26 = sshll.u32 %s660_s23, 4  ;;  %s665_s26 = int_to_ptr.hbm [resolvable:$true] %s664_s26 }
 0x182   : > { %s930_s28 = sshra.s32 %s665_s26, 4  ;;  %s931_s28 = int_to_ptr.hbm [resolvable:$true] %s930_s28 }
 0x183   : > { %866 = vrot.lane.b32.xlu1 %v875_v55, %s985_s13  ;;  %s932_s9 = scalar_lea.hbm %s931_s28, 8  ;;  %p937_p0 = scmp.lt.s32.totalorder %s931_s28, %s1320_s5 }
 0x184   : > { %p933_p6 = scmp.ne.s32.totalorder %s931_s28, %s932_s9  ;;  %p938_p1 = scmp.lt.s32.totalorder %s936_s12, %s932_s9 }
 0x186   : > { %p934_p9 = pnand %p933_p6, %p1073_p11  ;;  %p939_p3 = por %p938_p1, %p937_p0 }
 0x188   : > { %p935_p13 = pneg %p934_p9 }
 0x189   : > { %577 = vperm.xlu2 %885, %v574_v0  }
 0x18a   : > { %p940_p4 = pnand %p939_p3, %p935_p13 }
 0x18b   : > { %881 = vrot.lane.b32.xlu1 %v875_v55, %s990_s25  ;;  %s662_s25 = sshll.u32 %s242_s22, 4  ;;  %s663_s25 = int_to_ptr.vmem [resolvable:$true] %s662_s25 }
 0x1cb   : > { %v536_v56 = vpop.permute.xlu2 %535 }
 0x1cc   : > { %v540_v57 = vsel %vm361_vm6, %v536_v56, 0.0 }
 0x1cd   : > { %v542_v58 = vsel %vm1137_vm1, 0.0, %v540_v57 }
 0x1ce   : > { %750 = vmatpush.msk.msra.mxu3 %vm395_vm9, %v542_v58 }
 0x1d3   : > { %v862_v59 = vpop.permute.xlu2 %861 }
 0x1d4   : > { %v864_v60 = vunpack.i.h.bf16 %v862_v59  ;;  %v863_v61 = vunpack.i.l.bf16 %v862_v59 }
 0x1d6   : > { %v520_v5 = vsel %vm336_vm4, %v864_v60, %v863_v61  ;;  %v523_v6 = vsel %vm336_vm4, %v863_v61, 0.0  ;;  %v573_v60 = vld [vmem:[%s1318_s3] sm:$0xf] }
 0x1d7   : > { %v524_v11 = vsel %vm1147_vm5, 0.0, %v520_v5  ;;  %v525_v12 = vsel %vm1158_vm7, 0.0, %v523_v6 }
 0x1db   : > { %v872_v20 = vpop.permute.xlu2 %871 }
 0x1dc   : > { %v874_v25 = vunpack.i.h.bf16 %v872_v20  ;;  %v873_v26 = vunpack.i.l.bf16 %v872_v20 }
 0x1de   : > { %v493_v34 = vsel %vm290_vm12, 0.0, %v873_v26  ;;  %v490_v35 = vsel %vm290_vm12, %v873_v26, %v874_v25 }
 0x1df   : > { %v494_v45 = vsel %vm1141_vm3, 0.0, %v493_v34  ;;  %v495_v46 = vsel %vm1137_vm1, 0.0, %v490_v35 }
 0x1e3   : > { %v534_v62 = vpop.permute.xlu0 %533  ;;  %v578_v48 = vpop.permute.xlu2 %577 }
 0x1e4   : > { %v537_v63 = vsel %vm361_vm6, %v534_v62, %v536_v56 }
 0x1e5   : > { %v852_v1 = vpop.permute.xlu1 %851  ;;  %v541_v2 = vsel %vm1141_vm3, 0.0, %v537_v63 }
 0x1e6   : > { %v854_v3 = vunpack.i.h.bf16 %v852_v1  ;;  %v853_v4 = vunpack.i.l.bf16 %v852_v1  ;;  %748 = vmatpush.msk.msra.mxu2 %vm395_vm9, %v541_v2  ;;  %v631_v1 = vld.sshfl [vmem:[#allocation1 + $0x8] sm:$0xff pattern:$0x75316420] }
 0x1e8   : > { %v532_v7 = vsel %vm350_vm2, %v853_v4, 0.0  ;;  %v530_v8 = vsel %vm350_vm2, %v854_v3, %v853_v4 }
 0x1e9   : > { %v562_v9 = vrot.slane %v532_v7, 4  ;;  %v561_v10 = vrot.slane %v530_v8, 4 }
 0x1eb   : > { %v571_v13 = vsel %vm395_vm9, %v524_v11, %v561_v10  ;;  %v572_v14 = vsel %vm395_vm9, %v525_v12, %v562_v9  ;;  %v877_v30 = vpop.permute.xlu0 %876 }
 0x1ec   : > { %601 = vmatpush.msra.mxu2 %v571_v13  ;;  %621 = vmatpush.msra.mxu3 %v572_v14  ;;  %v879_v37 = vunpack.i.h.bf16 %v877_v30  ;;  %v878_v39 = vunpack.i.l.bf16 %v877_v30 }
 0x1ed   : > { %v857_v15 = vpop.permute.xlu1 %856 }
 0x1ee   : > { %v859_v16 = vunpack.i.h.bf16 %v857_v15  ;;  %v858_v17 = vunpack.i.l.bf16 %v857_v15  ;;  %v483_v50 = vsel %vm279_vm10, %v878_v39, %v879_v37 }
 0x1ef   : > { %v545_v57 = vrot.slane %v483_v50, 4 }
 0x1f0   : > { %v513_v18 = vsel %vm322_vm0, %v858_v17, 0.0  ;;  %v510_v19 = vsel %vm322_vm0, %v859_v16, %v858_v17 }
 0x1f1   : > { %v515_v21 = vsel %vm1137_vm1, 0.0, %v513_v18  ;;  %v514_v22 = vsel %vm1141_vm3, 0.0, %v510_v19 }
 0x1f2   : > { %v556_v23 = vrot.slane %v514_v22, 4  ;;  %v557_v24 = vrot.slane %v515_v21, 4 }
 0x1f4   : > { %v569_v27 = vsel %vm395_vm9, %v465_v51, %v556_v23  ;;  %v570_v28 = vsel %vm395_vm9, %v466_v52, %v557_v24  ;;  %v485_v51 = vsel %vm279_vm10, 0.0, %v878_v39 }
 0x1f5   : > { %v867_v29 = vpop.permute.xlu1 %866  ;;  %602 = vmatpush.msra.mxu2 %v569_v27  ;;  %622 = vmatpush.msra.mxu3 %v570_v28  ;;  %v544_v56 = vrot.slane %v485_v51, 4 }
 0x1f6   : > { %v869_v31 = vunpack.i.h.bf16 %v867_v29  ;;  %v868_v32 = vunpack.i.l.bf16 %v867_v29 }
 0x1f8   : > { %v503_v33 = vsel %vm308_vm8, 0.0, %v868_v32  ;;  %v500_v36 = vsel %vm308_vm8, %v868_v32, %v869_v31 }
 0x1f9   : > { %v504_v40 = vsel %vm1147_vm5, 0.0, %v503_v33  ;;  %v505_v41 = vsel %vm1158_vm7, 0.0, %v500_v36 }
 0x1fa   : > { %v550_v42 = vrot.slane %v504_v40, 4  ;;  %v551_v44 = vrot.slane %v505_v41, 4 }
 0x1fc   : > { %v567_v47 = vsel %vm395_vm9, %v494_v45, %v550_v42  ;;  %v568_v49 = vsel %vm395_vm9, %v495_v46, %v551_v44 }
 0x1fd   : > { %v882_v52 = vpop.permute.xlu1 %881  ;;  %603 = vmatpush.msra.mxu2 %v567_v47  ;;  %623 = vmatpush.msra.mxu3 %v568_v49 }
 0x1fe   : > { %v884_v53 = vunpack.i.h.bf16 %v882_v52  ;;  %v883_v55 = vunpack.i.l.bf16 %v882_v52 }
 0x200   : > { %v476_v43 = vsel %vm261_vm11, 0.0, %v883_v55  ;;  %v473_v38 = vsel %vm261_vm11, %v883_v55, %v884_v53 }
 0x201   : > { %v477_v58 = vsel %vm1147_vm5, 0.0, %v476_v43  ;;  %v478_v59 = vsel %vm1158_vm7, 0.0, %v473_v38 }
 0x202   : > { %v565_v61 = vsel %vm395_vm9, %v477_v58, %v544_v56  ;;  %v566_v62 = vsel %vm395_vm9, %v478_v59, %v545_v57 }
 0x203   : > { %604 = vmatpush.msra.mxu2 %v565_v61  ;;  %624 = vmatpush.msra.mxu3 %v566_v62 }
 0x204   : > { %749 = vmatmul.msk.f32.vlgmr.msra.gmra.mxu2 %vm411_vm13, %v573_v60  ;;  %751 = vmatmul.msk.f32.vlgmr.msra.gmra.mxu3 %vm411_vm13, %v573_v60 }
 0x287   : > { %v606_v63 = vpop.f32.mrf.mxu2  ;;  %v626_v0 = vpop.f32.mrf.mxu3 }
 0x288   : > { %v607_v2 = vadd.f32 %v606_v63, %v578_v48  ;;  %v627_v3 = vadd.f32 %v626_v0, %v578_v48 }
 0x28a   : > { %v634_v4 = vadd.f32 %v630_v54, %v607_v2  ;;  %v635_v5 = vadd.f32 %v631_v1, %v627_v3 }
 0x28c   : > { %v638_v6 = vmul.f32 0.2, %v634_v4  ;;  %vm637_vm0 = vcmp.gt.f32.partialorder %v635_v5, 0.0  ;;  %v639_v7 = vmul.f32 0.2, %v635_v5  ;;  %vm636_vm1 = vcmp.gt.f32.partialorder %v634_v4, 0.0 }
 0x28e   : > { %v641_v8 = vsel %vm637_vm0, %v635_v5, %v639_v7  ;;  %v640_v10 = vsel %vm636_vm1, %v634_v4, %v638_v6 }
 0x28f   : > { %v644_v9 = vrot.slane %v641_v8, 4 }
 0x291   : > { %v645_v11 = vsel %vm395_vm9, %v640_v10, %v644_v9 }
 0x292   : > { %647 = vst [vmem:[%s242_s22] sm:$0xff] %v645_v11 }
 0x293   : > { %943 = shalt.err (!%p940_p4)
}
 0x294   : > { %761 = dma.vmem_to_hbm [thread:$0]  (%p1073_p11), %s663_s25, 128, %s665_s26, %s649_s8  }
 0x295 PF: > { %s676_s7 = sand.u32 1, %s970_s18   ;;  %p1334_p7 = scmp.ge.s32.totalorder %s982_s21, 2 }
 0x296   : > { %s677_s13 = scalar_lea.sflag [#allocation4], %s676_s7 }
 0x297   : > { %p768_p5 = pnand %p1334_p7, %p1077_p12 }
 0x299   : > { %p769_p8 = pneg %p768_p5 }
 0x29b   : > { %965 = dma.done.wait (%p769_p8), %s677_s13, 128  }
 0x29c   : > { %967 = vsyncadd (%p769_p8), %s677_s13, 4294967168  ;;  %p18_p10 = scmp.ge.s32.totalorder %s1048_s24, 4   ;;  %s1335_s18 = smov %s974_s19 }
 0x29d   : > { %s1336_s19 = smov %s978_s20  ;;  %s1337_s20 = smov %s1060_s27 }
 0x29e   : > { %s1338_s21 = smov %s1048_s24  ;;  %20 = sbr.rel (!%p18_p10) target bundleno = 5 (0x5), region = 85 }
 0x2a3   :  { %683 = vsyncpa [#allocation3], 1 }
 0x2a4   :  { %685 = vsyncpa [#allocation3 + $0x1], 1 }
 0x2a5   :  { %686 = vsyncpa [#allocation4], 1 }
 0x2a6   :  { %688 = vsyncpa [#allocation4 + $0x1], 1 }

</bundles_post_ra>
